<compile_context>
chip_gen: v7x
topology: tpu7x:2x2x1
jax: 0.10.0
libtpu: 0.0.40
codegen_flags: <defaults>
</compile_context>

<pallas_src>
import functools

import jax
import jax.numpy as jnp
from jax import lax
from jax.experimental import pallas as pl
from jax.experimental.pallas import tpu as pltpu


def _channel_attention_kernel(x_ref, w1_ref, w2_ref, o_ref,
                              sum_ref, max_ref, *, inv_l, valid_len):
    # x_ref:   (1, C, Lt)   one batch element, one L tile (Lt multiple of 128)
    # w1_ref:  (Hid, C)     fc1 weight (out, in), VMEM-resident
    # w2_ref:  (C, Hid)     fc2 weight (out, in), VMEM-resident
    # o_ref:   (1, C, 1)    sigmoid gate for this batch element
    # sum_ref/max_ref: (C, 128) f32 lane-wise accumulators (persist across L tiles)
    # inv_l:   1 / (true H*W); valid_len: true L if L was zero-padded, else None
    l = pl.program_id(1)
    n_l = pl.num_programs(1)
    _, C, Lt = x_ref.shape
    n_chunks = Lt // 128

    @pl.when(l == 0)
    def _init():
        sum_ref[...] = jnp.zeros_like(sum_ref)
        max_ref[...] = jnp.full_like(max_ref, -jnp.inf)

    if valid_len is not None:
        lane_ids = lax.broadcasted_iota(jnp.int32, (C, 128), 1)
        tile_base = l * Lt

    def body(j, carry):
        s, m = carry
        off = pl.multiple_of(j * 128, 128)
        chunk = x_ref[0, :, pl.ds(off, 128)].astype(jnp.float32)   # (C, 128)
        s = s + chunk
        if valid_len is not None:
            # zero padding is exact for the sum; mask it to -inf for the max
            chunk = jnp.where(tile_base + off + lane_ids < valid_len,
                              chunk, -jnp.inf)
        m = jnp.maximum(m, chunk)
        return s, m

    s, m = lax.fori_loop(0, n_chunks, body,
                         (sum_ref[...], max_ref[...]),
                         unroll=min(8, n_chunks))
    sum_ref[...] = s
    max_ref[...] = m

    @pl.when(l == n_l - 1)
    def _finalize():
        # Single cross-lane reduce per batch element; results stay channel-major
        # (C on sublanes) so no relayout is needed before the matmuls.
        avg = jnp.sum(sum_ref[...], axis=-1, keepdims=True) * inv_l   # (C, 1)
        mx = jnp.max(max_ref[...], axis=-1, keepdims=True)            # (C, 1)
        y = jnp.concatenate([avg, mx], axis=1)                        # (C, 2)
        w1 = w1_ref[...].astype(jnp.float32)                          # (Hid, C)
        w2 = w2_ref[...].astype(jnp.float32)                          # (C, Hid)
        h = jnp.maximum(jnp.dot(w1, y, preferred_element_type=jnp.float32), 0.0)
        z = jnp.dot(w2, h, preferred_element_type=jnp.float32)        # (C, 2)
        gate = jax.nn.sigmoid(z[:, 0:1] + z[:, 1:2])                  # (C, 1)
        o_ref[0] = gate.astype(o_ref.dtype)


def _choose_l_tile(L, C, itemsize, block_bytes):
    """Largest 128-multiple lane tile within the byte budget; prefer exact division."""
    n_chunks = -(-L // 128)                                  # 128-lane chunks
    budget_chunks = max(1, block_bytes // (C * 128 * itemsize))
    budget_chunks = min(budget_chunks, n_chunks)
    best = 1
    for d in range(budget_chunks, 0, -1):
        if n_chunks % d == 0:
            best = d
            break
    # If the only exact divisor is much smaller than the budget, take the budget
    # and accept a small zero-padded tail instead of overhead-dominated steps.
    if best < max(1, budget_chunks // 4):
        best = budget_chunks
    return best * 128


def channel_attention(x, fc1_w, fc2_w, *, block_bytes=8 * 1024 * 1024):
    """x: (B, C, H, W); fc1_w: (C//ratio, C); fc2_w: (C, C//ratio).

    fc1_w / fc2_w are the PyTorch 1x1-conv weights with the trailing (1, 1)
    spatial dims squeezed (Linear layout (out, in)).
    Returns the sigmoid channel-attention map of shape (B, C, 1, 1).
    """
    B, C, H, W = x.shape
    L = H * W
    Hid = fc1_w.shape[0]
    itemsize = jnp.dtype(x.dtype).itemsize

    l_tile = _choose_l_tile(L, C, itemsize, block_bytes)
    n_l = -(-L // l_tile)
    L_pad = n_l * l_tile

    x2 = x.reshape(B, C, L)
    if L_pad != L:
        x2 = jnp.pad(x2, ((0, 0), (0, 0), (0, L_pad - L)))

    w1 = jnp.asarray(fc1_w)                                  # (Hid, C)
    w2 = jnp.asarray(fc2_w)                                  # (C, Hid)

    kernel = functools.partial(
        _channel_attention_kernel,
        inv_l=1.0 / L,
        valid_len=(L if L_pad != L else None),
    )

    block_b = C * l_tile * itemsize
    vmem_limit = int(min(64 * 1024 * 1024,
                         max(32 * 1024 * 1024, 2 * block_b + 8 * 1024 * 1024)))

    gate = pl.pallas_call(
        kernel,
        out_shape=jax.ShapeDtypeStruct((B, C, 1), x.dtype),
        grid_spec=pltpu.PrefetchScalarGridSpec(
            num_scalar_prefetch=0,
            grid=(B, n_l),
            in_specs=[
                pl.BlockSpec((1, C, l_tile), lambda b, l: (b, 0, l)),
                pl.BlockSpec((Hid, C), lambda b, l: (0, 0)),   # resident weights
                pl.BlockSpec((C, Hid), lambda b, l: (0, 0)),
            ],
            out_specs=pl.BlockSpec((1, C, 1), lambda b, l: (b, 0, 0)),
            scratch_shapes=[
                pltpu.VMEM((C, 128), jnp.float32),   # lane-wise running sum
                pltpu.VMEM((C, 128), jnp.float32),   # lane-wise running max
            ],
        ),
        compiler_params=pltpu.CompilerParams(
            # TODO(synk): on v7x with B == 1 the "parallel" batch axis cannot feed
            # both TensorCores; splitting L across cores would need a 2-stage combine.
            dimension_semantics=("parallel", "arbitrary"),
            vmem_limit_bytes=vmem_limit,
        ),
        cost_estimate=pl.CostEstimate(
            flops=2 * B * C * L_pad                      # streaming sum + max
                  + B * (2 * 2 * C * Hid * 2),           # merged fc1/fc2 matmuls
            transcendentals=B * C,                       # sigmoid
            bytes_accessed=B * C * L_pad * itemsize + B * C * itemsize
                           + 2 * C * Hid * 4,
        ),
    )(x2, w1, w2)

    return gate.reshape(B, C, 1, 1)


def channel_attention_ref(x, fc1_w, fc2_w):
    """Pure-JAX reference mirroring the PyTorch module."""
    avg = jnp.mean(x, axis=(2, 3))                       # (B, C)
    mx = jnp.max(x, axis=(2, 3))                         # (B, C)

    def excite(y):
        h = jnp.maximum(y @ fc1_w.T, 0.0)
        return h @ fc2_w.T

    return jax.nn.sigmoid(excite(avg) + excite(mx))[:, :, None, None]


if __name__ == "__main__":
    # ChannelAttention(in_planes=64, ratio=8) -> hidden = 8
    B, C, H, W = 2, 64, 16, 16
    ratio = 8
    Hid = C // ratio

    key = jax.random.PRNGKey(0)
    kx, k1, k2, kx2 = jax.random.split(key, 4)
    x = jax.random.normal(kx, (B, C, H, W), dtype=jnp.float32)
    # 1x1 conv weights with spatial dims squeezed -> Linear layout (out, in).
    fc1_w = jax.random.normal(k1, (Hid, C), dtype=jnp.float32) * 0.1
    fc2_w = jax.random.normal(k2, (C, Hid), dtype=jnp.float32) * 0.1

    out = jax.block_until_ready(channel_attention(x, fc1_w, fc2_w))
    ref = channel_attention_ref(x, fc1_w, fc2_w)
    assert out.shape == (B, C, 1, 1)
    assert jnp.allclose(out, ref, atol=1e-5, rtol=1e-5), "mismatch vs reference"

    # Second check: spatial extent that is NOT a multiple of 128 (pad + mask path).
    x_odd = jax.random.normal(kx2, (B, C, 9, 9), dtype=jnp.float32)
    out_odd = jax.block_until_ready(channel_attention(x_odd, fc1_w, fc2_w))
    ref_odd = channel_attention_ref(x_odd, fc1_w, fc2_w)
    assert jnp.allclose(out_odd, ref_odd, atol=1e-5, rtol=1e-5), "mismatch (padded L)"

    print("KERNEL_OK")
</pallas_src>

<mosaic_0001>
module attributes {stable_mosaic.version = 11 : i64} {
  func.func @_channel_attention_kernel(%arg0: i32, %arg1: i32, %arg2: memref<1x64x256xf32, #tpu.memory_space<vmem>>, %arg3: memref<8x64xf32, #tpu.memory_space<vmem>>, %arg4: memref<64x8xf32, #tpu.memory_space<vmem>>, %arg5: memref<1x64x1xf32, #tpu.memory_space<vmem>>, %arg6: memref<64x128xf32, #tpu.memory_space<vmem>>, %arg7: memref<64x128xf32, #tpu.memory_space<vmem>>) attributes {dimension_semantics = [#tpu.dimension_semantics<parallel>, #tpu.dimension_semantics<arbitrary>], iteration_bounds = array<i64: 2, 1>, scalar_prefetch = 0 : i64, scratch_operands = 2 : i64, tpu.core_type = #tpu.core_type<tc>, window_params = [{transform_indices = @transform_0, window_bounds = array<i64: 1, 64, 256>}, {pipeline_mode = #tpu.pipeline_mode<synchronous>, transform_indices = @transform_1, window_bounds = array<i64: 8, 64>}, {pipeline_mode = #tpu.pipeline_mode<synchronous>, transform_indices = @transform_2, window_bounds = array<i64: 64, 8>}, {transform_indices = @transform_3, window_bounds = array<i64: 1, 64, 1>}]} {
    %c0_i32 = arith.constant 0 : i32
    %0 = arith.cmpi eq, %arg1, %c0_i32 : i32
    %1 = arith.extui %0 : i1 to i32
    %c0_i32_0 = arith.constant 0 : i32
    %2 = arith.cmpi ne, %1, %c0_i32_0 : i32
    scf.if %2 {
      %cst = arith.constant 0.000000e+00 : f32
      %24 = vector.broadcast %cst : f32 to vector<64x128xf32>
      %c0_16 = arith.constant 0 : index
      %c0_17 = arith.constant 0 : index
      %25 = vector.load %arg6[%c0_16, %c0_17] : memref<64x128xf32, #tpu.memory_space<vmem>>, vector<64x128xf32>
      tpu.vector_store %arg6[%c0_16, %c0_17], %24 {strides = array<i32>} : memref<64x128xf32, #tpu.memory_space<vmem>>, vector<64x128xf32>,
      %cst_18 = arith.constant 0xFF800000 : f32
      %26 = vector.broadcast %cst_18 : f32 to vector<64x128xf32>
      %c0_19 = arith.constant 0 : index
      %c0_20 = arith.constant 0 : index
      %27 = vector.load %arg7[%c0_19, %c0_20] : memref<64x128xf32, #tpu.memory_space<vmem>>, vector<64x128xf32>
      tpu.vector_store %arg7[%c0_19, %c0_20], %26 {strides = array<i32>} : memref<64x128xf32, #tpu.memory_space<vmem>>, vector<64x128xf32>,
    } else {
    }
    %c0 = arith.constant 0 : index
    %c0_1 = arith.constant 0 : index
    %3 = vector.load %arg6[%c0, %c0_1] : memref<64x128xf32, #tpu.memory_space<vmem>>, vector<64x128xf32>
    %c0_2 = arith.constant 0 : index
    %c0_3 = arith.constant 0 : index
    %4 = vector.load %arg7[%c0_2, %c0_3] : memref<64x128xf32, #tpu.memory_space<vmem>>, vector<64x128xf32>
    %c0_i32_4 = arith.constant 0 : i32
    %c128_i32 = arith.constant 128 : i32
    %5 = arith.muli %c0_i32_4, %c128_i32 : i32
    %6 = tpu.assume_multiple %5, 128 : i32
    %c0_5 = arith.constant 0 : index
    %c0_6 = arith.constant 0 : index
    %7 = arith.index_cast %6 : i32 to index
    %8 = vector.load %arg2[%c0_5, %c0_6, %7] : memref<1x64x256xf32, #tpu.memory_space<vmem>>, vector<1x64x128xf32>
    %9 = vector.shape_cast %8 : vector<1x64x128xf32> to vector<64x128xf32>
    %10 = arith.addf %3, %9 : vector<64x128xf32>
    %11 = arith.maximumf %4, %9 : vector<64x128xf32>
    %c1_i32 = arith.constant 1 : i32
    %c128_i32_7 = arith.constant 128 : i32
    %12 = arith.muli %c1_i32, %c128_i32_7 : i32
    %13 = tpu.assume_multiple %12, 128 : i32
    %c0_8 = arith.constant 0 : index
    %c0_9 = arith.constant 0 : index
    %14 = arith.index_cast %13 : i32 to index
    %15 = vector.load %arg2[%c0_8, %c0_9, %14] : memref<1x64x256xf32, #tpu.memory_space<vmem>>, vector<1x64x128xf32>
    %16 = vector.shape_cast %15 : vector<1x64x128xf32> to vector<64x128xf32>
    %17 = arith.addf %10, %16 : vector<64x128xf32>
    %18 = arith.maximumf %11, %16 : vector<64x128xf32>
    %c2_i32 = arith.constant 2 : i32
    %c0_10 = arith.constant 0 : index
    %c0_11 = arith.constant 0 : index
    %19 = vector.load %arg6[%c0_10, %c0_11] : memref<64x128xf32, #tpu.memory_space<vmem>>, vector<64x128xf32>
    tpu.vector_store %arg6[%c0_10, %c0_11], %17 {strides = array<i32>} : memref<64x128xf32, #tpu.memory_space<vmem>>, vector<64x128xf32>,
    %c0_12 = arith.constant 0 : index
    %c0_13 = arith.constant 0 : index
    %20 = vector.load %arg7[%c0_12, %c0_13] : memref<64x128xf32, #tpu.memory_space<vmem>>, vector<64x128xf32>
    tpu.vector_store %arg7[%c0_12, %c0_13], %18 {strides = array<i32>} : memref<64x128xf32, #tpu.memory_space<vmem>>, vector<64x128xf32>,
    %c0_i32_14 = arith.constant 0 : i32
    %21 = arith.cmpi eq, %arg1, %c0_i32_14 : i32
    %22 = arith.extui %21 : i1 to i32
    %c0_i32_15 = arith.constant 0 : i32
    %23 = arith.cmpi ne, %22, %c0_i32_15 : i32
    scf.if %23 {
      %c0_16 = arith.constant 0 : index
      %c0_17 = arith.constant 0 : index
      %24 = vector.load %arg6[%c0_16, %c0_17] : memref<64x128xf32, #tpu.memory_space<vmem>>, vector<64x128xf32>
      %cst = arith.constant dense<0.000000e+00> : vector<64xf32>
      %25 = vector.multi_reduction <add>, %24, %cst [1] : vector<64x128xf32> to vector<64xf32>
      %26 = vector.shape_cast %25 : vector<64xf32> to vector<64x1xf32>
      %cst_18 = arith.constant 3.906250e-03 : f32
      %27 = vector.broadcast %cst_18 : f32 to vector<64x1xf32>
      %28 = arith.mulf %26, %27 : vector<64x1xf32>
      %c0_19 = arith.constant 0 : index
      %c0_20 = arith.constant 0 : index
      %29 = vector.load %arg7[%c0_19, %c0_20] : memref<64x128xf32, #tpu.memory_space<vmem>>, vector<64x128xf32>
      %cst_21 = arith.constant dense<0xFF800000> : vector<64xf32>
      %30 = vector.multi_reduction <maximumf>, %29, %cst_21 [1] : vector<64x128xf32> to vector<64xf32>
      %31 = vector.shape_cast %30 : vector<64xf32> to vector<64x1xf32>
      %32 = tpu.concatenate %28, %31 in 1 : vector<64x1xf32>, vector<64x1xf32> -> vector<64x2xf32>
      %c0_22 = arith.constant 0 : index
      %c0_23 = arith.constant 0 : index
      %33 = vector.load %arg3[%c0_22, %c0_23] : memref<8x64xf32, #tpu.memory_space<vmem>>, vector<8x64xf32>
      %c0_24 = arith.constant 0 : index
      %c0_25 = arith.constant 0 : index
      %34 = vector.load %arg4[%c0_24, %c0_25] : memref<64x8xf32, #tpu.memory_space<vmem>>, vector<64x8xf32>
      %cst_26 = arith.constant dense<0.000000e+00> : vector<8x2xf32>
      %35 = tpu.matmul %33, %32, %cst_26 {dimension_numbers = #tpu.dot_dimension_numbers<[1], [0], [0], [1], [0, 0, 1, 1], [], []>} : vector<8x64xf32>, vector<64x2xf32>, vector<8x2xf32> -> vector<8x2xf32>
      %cst_27 = arith.constant 0.000000e+00 : f32
      %36 = vector.broadcast %cst_27 : f32 to vector<8x2xf32>
      %37 = arith.maximumf %35, %36 : vector<8x2xf32>
      %cst_28 = arith.constant dense<0.000000e+00> : vector<64x2xf32>
      %38 = tpu.matmul %34, %37, %cst_28 {dimension_numbers = #tpu.dot_dimension_numbers<[1], [0], [0], [1], [0, 0, 1, 1], [], []>} : vector<64x8xf32>, vector<8x2xf32>, vector<64x2xf32> -> vector<64x2xf32>
      %39 = vector.extract_strided_slice %38 {offsets = [0, 0], sizes = [64, 1], strides = [1, 1]} : vector<64x2xf32> to vector<64x1xf32>
      %40 = vector.extract_strided_slice %38 {offsets = [0, 1], sizes = [64, 1], strides = [1, 1]} : vector<64x2xf32> to vector<64x1xf32>
      %41 = arith.addf %39, %40 : vector<64x1xf32>
      %42 = arith.negf %41 : vector<64x1xf32>
      %43 = math.exp %42 : vector<64x1xf32>
      %cst_29 = arith.constant 1.000000e+00 : f32
      %44 = vector.broadcast %cst_29 : f32 to vector<64x1xf32>
      %45 = arith.addf %44, %43 : vector<64x1xf32>
      %46 = arith.divf %44, %45 : vector<64x1xf32>
      %c0_30 = arith.constant 0 : index
      %c0_31 = arith.constant 0 : index
      %c0_32 = arith.constant 0 : index
      %47 = vector.load %arg5[%c0_30, %c0_31, %c0_32] : memref<1x64x1xf32, #tpu.memory_space<vmem>>, vector<1x64x1xf32>
      %48 = vector.shape_cast %47 : vector<1x64x1xf32> to vector<64x1xf32>
      %49 = vector.shape_cast %46 : vector<64x1xf32> to vector<1x64x1xf32>
      tpu.vector_store %arg5[%c0_30, %c0_31, %c0_32], %49 {strides = array<i32>} : memref<1x64x1xf32, #tpu.memory_space<vmem>>, vector<1x64x1xf32>,
    } else {
    }
    return
  }
  func.func @transform_0(%arg0: i32, %arg1: i32) -> (i32, i32, i32) {
    %c0_i32 = arith.constant 0 : i32
    %c0_i32_0 = arith.constant 0 : i32
    return %arg0, %c0_i32, %arg1 : i32, i32, i32
  }
  func.func @transform_1(%arg0: i32, %arg1: i32) -> (i32, i32) {
    %c0_i32 = arith.constant 0 : i32
    %c0_i32_0 = arith.constant 0 : i32
    %c0_i32_1 = arith.constant 0 : i32
    return %c0_i32, %c0_i32_0 : i32, i32
  }
  func.func @transform_2(%arg0: i32, %arg1: i32) -> (i32, i32) {
    %c0_i32 = arith.constant 0 : i32
    %c0_i32_0 = arith.constant 0 : i32
    %c0_i32_1 = arith.constant 0 : i32
    return %c0_i32, %c0_i32_0 : i32, i32
  }
  func.func @transform_3(%arg0: i32, %arg1: i32) -> (i32, i32, i32) {
    %c0_i32 = arith.constant 0 : i32
    %c0_i32_0 = arith.constant 0 : i32
    %c0_i32_1 = arith.constant 0 : i32
    return %arg0, %c0_i32, %c0_i32_0 : i32, i32, i32
  }
}

</mosaic_0001>

<bundles_post_ra>
// kernel: tpu_custom_call.1
= control target key start
LH: loop header
LB: loop body
LE: loop exit
PB: predicated region body
PF: predicated region fallthrough
CT: control target
= control target key end

     0   :  { %8 = vsyncpa [#allocation5], 0  ;;  %s1263_s0 = inlined_call_operand.hbm [shape: f32[2,64,256], index: 0, kind: input, shape index: {}]   ;;  %s1264_s1 = inlined_call_operand.vmem [shape: f32[8,64], index: 1, kind: input, shape index: {}]   ;;  %s1265_s2 = inlined_call_operand.vmem [shape: f32[64,8], index: 2, kind: input, shape index: {}]   ;;  %s1266_s3 = inlined_call_operand.vmem [shape: f32[2,64,1], index: 3, kind: output, shape index: {}]  }
   0x1   :  { %10 = vsyncpa [#allocation5 + $0x1], 0  ;;  %s1070_s12 = smov 0   ;;  %s1072_s13 = smov 0  }
   0x2   :  { %s1074_s14 = smov 0   ;;  %s1076_s15 = smov 0  }
   0x3   :  { %s1078_s16 = smov 0   ;;  %s1080_s17 = smov 0  }
   0x4 LB: > { %s765_s18 = sadd.s32 4294967295, %s1041_s17   ;;  %s28_s19 = sadd.s32 1, %s1037_s16  ;;  %s1041_s17 = sphi %s1080_s17, %s16_s17   ;;  %s1037_s16 = sphi %s1078_s16, %s1274_s16   ;;  %s1033_s15 = sphi %s1076_s15, %s1273_s15   ;;  %s1029_s14 = sphi %s1074_s14, %s1272_s14   ;;  %s1025_s13 = sphi %s1072_s13, %s1271_s13   ;;  %s1021_s12 = sphi %s1070_s12, %s1270_s12  }
   0x5   : > { %p30_p0 = scmp.ge.s32.totalorder %s28_s19, 2  ;;  %s37_s20 = sadd.s32 1, %s1029_s14 }
   0x6   : > { %p44_p1 = scmp.ne.s32.totalorder %s1029_s14, %s1025_s13  ;;  %p45_p2 = scmp.eq.s32.totalorder %s1041_s17, 0 }
   0x7   : > { %s1276_s19 = smov (%p30_p0, %s28_s19), 0  ;;  %p50_p4 = scmp.ne.s32.totalorder %s1025_s13, %s1021_s12 }
   0x8   : > { %p1106_p3 = por %p45_p2, %p44_p1  ;;  %s32_s22 = ssub.s32 %s1037_s16, %s1276_s19 }
   0x9   : > { %p51_p5 = scmp.eq.s32.totalorder %s765_s18, 0  ;;  %p35_p6 = scmp.eq.s32.totalorder %s32_s22, 0 }
   0xa   : > { %p874_p8 = scmp.lt.s32.totalorder %s1041_s17, 2  ;;  %s148_s25 = sand.u32 1, %s1029_s14  }
   0xb   : > { %p1113_p7 = por %p51_p5, %p50_p4  ;;  %s803_s26 = sshll.u32 %s1037_s16, 11 }
   0xc   : > { %s1119_s24 = scalar_select %p35_p6, %s1029_s14, %s37_s20  }
   0xd   : > { %s769_s27 = sshll.u32 %s148_s25, 7  ;;  %s1126_s30 = scalar_lea.hbm %s1263_s0, %s803_s26 }
   0xe   : > { %s152_s4 = scalar_lea.vmem [#allocation4], %s769_s27  ;;  %p1130_p9 = pnand %p874_p8, %p1106_p3 }
   0xf   : > { %s161_s5 = sshll.u32 %s152_s4, 4  ;;  %s1136_s7 = scalar_lea.sflag [#allocation5], %s148_s25  ;;  %s1134_s5 = int_to_ptr.vmem [resolvable:$true] %s161_s5 }
  0x10   : > { %s961_s8 = scalar_lea.hbm %s1126_s30, 2048  ;;  %p963_p11 = pneg %p1130_p9 }
  0x11   : > { %p962_p10 = scmp.ne.s32.totalorder %s1126_s30, %s961_s8  ;;  %s966_s11 = scalar_lea.hbm %s1263_s0, 4096 }
  0x12   : > { %p967_p0 = scmp.lt.u32.totalorder %s1126_s30, %s1263_s0  ;;  %p968_p1 = scmp.lt.u32.totalorder %s966_s11, %s961_s8 }
  0x13   : > { %p964_p12 = pnand %p963_p11, %p962_p10  ;;  %p970_p3 = scmp.lt.u32.totalorder %s961_s8, %s1126_s30 }
  0x14   : > { %p969_p2 = por %p968_p1, %p967_p0 }
  0x15   : > { %p965_p13 = pneg %p964_p12 }
  0x16   : > { %p971_p4 = por %p970_p3, %p969_p2 }
  0x18   : > { %p972_p5 = pnand %p971_p4, %p965_p13 }
  0x1a   : > { %975 = shalt.err (!%p972_p5)
}
  0x1b   : > { %s976_s20 = scalar_lea.vmem %s1134_s5, 2048  ;;  %s1043_s21 = smov [#allocation4]  }
  0x1c   : > { %p977_p6 = scmp.ne.s32.totalorder %s1134_s5, %s976_s20  ;;  %s981_s22 = sshll.u32 %s1043_s21, 4  ;;  %s982_s22 = int_to_ptr.vmem [resolvable:$false] %s981_s22 }
  0x1d   : > { %s983_s25 = scalar_lea.vmem %s982_s22, 4096  ;;  %p984_p12 = scmp.lt.s32.totalorder %s1134_s5, %s982_s22 }
  0x1e   : > { %p979_p8 = pnand %p977_p6, %p963_p11  ;;  %p985_p0 = scmp.lt.s32.totalorder %s983_s25, %s976_s20 }
  0x20   : > { %p980_p10 = pneg %p979_p8  ;;  %p986_p1 = por %p985_p0, %p984_p12 }
  0x22   : > { %p987_p2 = pnand %p986_p1, %p980_p10 }
  0x24   : > { %990 = shalt.err (!%p987_p2)
}
  0x25   : > { %s1044_s26 = smov 256   ;;  %s1045_s27 = smov 16  }
  0x26   : > { %873 = dma.hbm_to_vmem [thread:$0]  (!%p1130_p9), %s1126_s30, 2048, %s1134_s5, %s1136_s7, %s1044_s26, %s1044_s26, %s1045_s27  }
  0x27   : > { %p772_p11 = scmp.ge.s32.totalorder %s1041_s17, 1  ;;  %p169_p13 = scmp.lt.s32.totalorder %s1041_s17, 3 }
  0x29   : > { %p170_p3 = pnand %p772_p11, %p169_p13 }
  0x2a   : > { %s175_s28 = sand.u32 (!%p170_p3), 1, %s1025_s13  }
  0x2b   : > { %173 = sbr.rel (%p170_p3) target bundleno = 818 (0x332), region = 32  ;;  %s773_s29 = sshll.u32 (!%p170_p3), %s175_s28, 7 }
  0x2c   : > { %s176_s4 = scalar_lea.sflag (!%p170_p3), [#allocation5], %s175_s28  ;;  %s1167_s8 = scalar_lea.vmem (!%p170_p3), [#allocation4], %s773_s29 }
  0x32   : > { %1016 = dma.done.wait (%p1113_p7), %s176_s4, 2048  }
  0x33   : > { %1018 = vsyncadd (%p1113_p7), %s176_s4, 4294965248  ;;  %v244_v0 = vld [vmem:[%s1167_s8] sm:$0xff]  ;;  %v776_v1 = vld [vmem:[%s1167_s8 + $0x8] sm:$0xff]  ;;  %v1046_v30 = vmov 0.0|0.0   ;;  %vm1047_vm0 = vmmov 0   ;;  %v1048_v33 = vmov 0.0  }
  0x34   : > { %v245_v2 = vld [vmem:[%s1167_s8 + $0x10] sm:$0xff]  ;;  %v285_v3 = vmax.f32 %v244_v0, %v776_v1  ;;  %v277_v4 = vadd.f32 %v776_v1, %v244_v0  ;;  %v777_v5 = vld [vmem:[%s1167_s8 + $0x18] sm:$0xff]  ;;  %v246_v10 = vld [vmem:[%s1167_s8 + $0x20] sm:$0xff]  ;;  %856 = vmatprep.subr.bf16.mxu0 %v1046_v30  ;;  %839 = vmatprep.mubr.msk.f32.mxu0 %vm1047_vm0, %v1048_v33  ;;  %vm368_vm1 = vcmask 7168   ;;  %vm386_vm2 = vcmask 523264   ;;  %s1049_s4 = smov 127  }
  0x35   : > { %v286_v6 = vmax.f32 %v245_v2, %v777_v5  ;;  %v278_v7 = vadd.f32 %v777_v5, %v245_v2  ;;  %v247_v8 = vld [vmem:[%s1167_s8 + $0x30] sm:$0xff]  ;;  %v779_v9 = vld [vmem:[%s1167_s8 + $0x38] sm:$0xff]  ;;  %v778_v11 = vld [vmem:[%s1167_s8 + $0x28] sm:$0xff]  ;;  %vm461_vm3 = vcmask 64512   ;;  %p203_p7 = scmp.lt.s32.totalorder %s1033_s15, 1 }
  0x36   : > { %352 = vmax.xlane.f32.xlu1 %v285_v3  ;;  %320 = vadd.xlane.f32.xlu0 %v277_v4  ;;  %v280_v12 = vadd.f32 %v779_v9, %v247_v8  ;;  %v279_v13 = vadd.f32 %v778_v11, %v246_v10  ;;  %v288_v14 = vmax.f32 %v247_v8, %v779_v9  ;;  %v249_v16 = vld [vmem:[%s1167_s8 + $0x50] sm:$0xff]  ;;  %v781_v17 = vld [vmem:[%s1167_s8 + $0x58] sm:$0xff]  ;;  %v248_v18 = vld [vmem:[%s1167_s8 + $0x40] sm:$0xff] }
  0x37   : > { %v287_v15 = vmax.f32 %v246_v10, %v778_v11  ;;  %v780_v19 = vld [vmem:[%s1167_s8 + $0x48] sm:$0xff]  ;;  %v282_v20 = vadd.f32 %v781_v17, %v249_v16  ;;  %v290_v22 = vmax.f32 %v249_v16, %v781_v17  ;;  %v251_v24 = vld [vmem:[%s1167_s8 + $0x70] sm:$0xff]  ;;  %v783_v25 = vld [vmem:[%s1167_s8 + $0x78] sm:$0xff]  ;;  %s1278_s15 = smov (!%p203_p7, %s1033_s15), 1 }
  0x38   : > { %v281_v21 = vadd.f32 %v780_v19, %v248_v18  ;;  %v289_v23 = vmax.f32 %v248_v18, %v780_v19  ;;  %v250_v26 = vld [vmem:[%s1167_s8 + $0x60] sm:$0xff]  ;;  %v782_v27 = vld [vmem:[%s1167_s8 + $0x68] sm:$0xff]  ;;  %v284_v28 = vadd.f32 %v783_v25, %v251_v24  ;;  %v292_v31 = vmax.f32 %v251_v24, %v783_v25  ;;  %v384_v16 = vld [vmem:[%s1265_s2 + $0x30] sm:$0xff]  ;;  %s804_s8 = sshll.u32 %s1278_s15, 6 }
  0x39   : > { %v283_v29 = vadd.f32 %v782_v27, %v250_v26  ;;  %v291_v32 = vmax.f32 %v250_v26, %v782_v27  ;;  %v379_v11 = vld [vmem:[%s1265_s2 + $0x8] sm:$0xff]  ;;  %v385_v17 = vld [vmem:[%s1265_s2 + $0x38] sm:$0xff]  ;;  %s207_s5 = scalar_lea.vmem %s1266_s3, %s804_s8 }
  0x3a   : > { %354 = vmax.xlane.f32.xlu1 %v286_v6  ;;  %322 = vadd.xlane.f32.xlu0 %v278_v7  ;;  %v377_v6 = vld [vmem:[%s1264_s1] sm:$0xff] }
  0x3b   : > { %v378_v7 = vld [vmem:[%s1265_s2] sm:$0xff] }
  0x3c   : > { %844 = vmatprep.mubr.msk.f32.mxu1 %vm461_vm3, %v378_v7 }
  0x3e   : > { %326 = vadd.xlane.f32.xlu1 %v280_v12  ;;  %324 = vadd.xlane.f32.xlu0 %v279_v13  ;;  %v380_v12 = vld [vmem:[%s1265_s2 + $0x10] sm:$0xff]  ;;  %v381_v13 = vld [vmem:[%s1265_s2 + $0x18] sm:$0xff] }
  0x42   : > { %358 = vmax.xlane.f32.xlu1 %v288_v14  ;;  %356 = vmax.xlane.f32.xlu0 %v287_v15  ;;  %v382_v14 = vld [vmem:[%s1265_s2 + $0x20] sm:$0xff]  ;;  %v383_v15 = vld [vmem:[%s1265_s2 + $0x28] sm:$0xff] }
  0x46   : > { %330 = vadd.xlane.f32.xlu1 %v282_v20  ;;  %328 = vadd.xlane.f32.xlu0 %v281_v21 }
  0x4a   : > { %362 = vmax.xlane.f32.xlu1 %v290_v22  ;;  %360 = vmax.xlane.f32.xlu0 %v289_v23 }
  0x4e   : > { %334 = vadd.xlane.f32.xlu1 %v284_v28  ;;  %332 = vadd.xlane.f32.xlu0 %v283_v29 }
  0x52   : > { %366 = vmax.xlane.f32.xlu1 %v292_v31  ;;  %364 = vmax.xlane.f32.xlu0 %v291_v32 }
  0xc3   : > { %v353_v34 = vpop.xlane.xlu1 %352  ;;  %v321_v35 = vpop.xlane.xlu0 %320 }
  0xc4   : > { %v336_v36 = vmul.f32 0.00390625, %v321_v35 }
  0xc6   : > { %v369_v40 = vsel %vm368_vm1, %v336_v36, %v353_v34 }
  0xc7   : > { %v355_v37 = vpop.xlane.xlu1 %354  ;;  %v323_v38 = vpop.xlane.xlu0 %322 }
  0xc8   : > { %v337_v39 = vmul.f32 0.00390625, %v323_v38 }
  0xca   : > { %v370_v41 = vsel %vm368_vm1, %v337_v39, %v355_v37 }
  0xcb   : > { %v327_v42 = vpop.xlane.xlu1 %326  ;;  %v325_v43 = vpop.xlane.xlu0 %324  ;;  %v857_v44 = vpack.c.bf16 %v370_v41, %v369_v40 }
  0xcc   : > { %v339_v45 = vmul.f32 0.00390625, %v327_v42  ;;  %v338_v46 = vmul.f32 0.00390625, %v325_v43 }
  0xcd   : > { %858 = vmatpush3.bf16.msra.mxu0 %v857_v44 }
  0xce   : > { %859 = vmatprep.subr.bf16.mxu0 %v1046_v30 }
  0xcf   : > { %v359_v47 = vpop.xlane.xlu1 %358  ;;  %v357_v48 = vpop.xlane.xlu0 %356 }
  0xd0   : > { %v372_v49 = vsel %vm368_vm1, %v339_v45, %v359_v47  ;;  %v371_v50 = vsel %vm368_vm1, %v338_v46, %v357_v48 }
  0xd1   : > { %v860_v51 = vpack.c.bf16 %v372_v49, %v371_v50 }
  0xd3   : > { %v331_v52 = vpop.xlane.xlu1 %330  ;;  %861 = vmatpush3.bf16.msra.mxu0 %v860_v51  ;;  %v329_v53 = vpop.xlane.xlu0 %328 }
  0xd4   : > { %862 = vmatprep.subr.bf16.mxu0 %v1046_v30  ;;  %v341_v54 = vmul.f32 0.00390625, %v331_v52  ;;  %v340_v55 = vmul.f32 0.00390625, %v329_v53 }
  0xd7   : > { %v363_v56 = vpop.xlane.xlu1 %362  ;;  %v361_v57 = vpop.xlane.xlu0 %360 }
  0xd8   : > { %v374_v58 = vsel %vm368_vm1, %v341_v54, %v363_v56  ;;  %v373_v59 = vsel %vm368_vm1, %v340_v55, %v361_v57 }
  0xd9   : > { %v863_v60 = vpack.c.bf16 %v374_v58, %v373_v59 }
  0xdb   : > { %v335_v61 = vpop.xlane.xlu1 %334  ;;  %864 = vmatpush3.bf16.msra.mxu0 %v863_v60  ;;  %v333_v62 = vpop.xlane.xlu0 %332 }
  0xdc   : > { %865 = vmatprep.subr.bf16.mxu0 %v1046_v30  ;;  %v343_v63 = vmul.f32 0.00390625, %v335_v61  ;;  %v342_v0 = vmul.f32 0.00390625, %v333_v62 }
  0xdf   : > { %v367_v1 = vpop.xlane.xlu1 %366  ;;  %v365_v2 = vpop.xlane.xlu0 %364 }
  0xe0   : > { %v376_v3 = vsel %vm368_vm1, %v343_v63, %v367_v1  ;;  %v375_v4 = vsel %vm368_vm1, %v342_v0, %v365_v2 }
  0xe1   : > { %v866_v5 = vpack.c.bf16 %v376_v3, %v375_v4 }
  0xe3   : > { %867 = vmatpush3.bf16.msra.mxu0 %v866_v5 }
  0xe6   : > { %840 = vmatmul.mubr.msk.f32.vlgmr.msra.gmra.mrb[0].mxu0 %vm386_vm2, %v377_v6 }
 0x1b9   : > { %v456_v8 = vpop.f32.mrb[0].mxu0 }
 0x1ba   : > { %v460_v9 = vmax.f32 %v456_v8, 0.0  ;;  %v841_v10 = vpop.f32.mrb[1].mxu0 }
 0x1bc   : > { %842 = vmatprep.subr.mxu1 %v460_v9 }
 0x1bd   : > { %843 = vmatpush3.msra.mxu1 %v460_v9 }
 0x1be   : > { %845 = vmatmul.mubr.msk.f32.vlgmr.msra.gmra.mrb[0].mxu1 %vm461_vm3, %v379_v11 }
 0x1bf   : > { %847 = vmatprep.mubr.msk.f32.mxu1 %vm461_vm3, %v380_v12 }
 0x1c2   : > { %848 = vmatmul.mubr.msk.f32.gmra.mrb[2].mxu1 %vm461_vm3, %v381_v13 }
 0x1c3   : > { %850 = vmatprep.mubr.msk.f32.mxu1 %vm461_vm3, %v382_v14 }
 0x1c6   : > { %851 = vmatmul.mubr.msk.f32.gmra.mrb[4].mxu1 %vm461_vm3, %v383_v15 }
 0x1c7   : > { %853 = vmatprep.mubr.msk.f32.mxu1 %vm461_vm3, %v384_v16 }
 0x1ca   : > { %854 = vmatmul.mubr.msk.f32.gmra.mrb[6].mxu1 %vm461_vm3, %v385_v17 }
 0x291   : > { %v846_v18 = vpop.f32.mrb[0].mxu1 }
 0x292   : > { %601 = vrot.lane.b32.xlu1 %v846_v18, %s1049_s4  ;;  %v552_v19 = vpop.f32.mrb[1].mxu1 }
 0x293   : > { %599 = vrot.lane.b32.xlu0 %v552_v19, %s1049_s4 }
 0x295   : > { %v849_v20 = vpop.f32.mrb[2].mxu1 }
 0x296   : > { %605 = vrot.lane.b32.xlu1 %v849_v20, %s1049_s4  ;;  %v562_v21 = vpop.f32.mrb[3].mxu1 }
 0x299   : > { %v852_v22 = vpop.f32.mrb[4].mxu1 }
 0x29a   : > { %603 = vrot.lane.b32.xlu1 %v562_v21, %s1049_s4  ;;  %v572_v23 = vpop.f32.mrb[5].mxu1 }
 0x29b   : > { %607 = vrot.lane.b32.xlu0 %v572_v23, %s1049_s4 }
 0x29d   : > { %v855_v24 = vpop.f32.mrb[6].mxu1 }
 0x29e   : > { %609 = vrot.lane.b32.xlu1 %v852_v22, %s1049_s4  ;;  %v582_v25 = vpop.f32.mrb[7].mxu1 }
 0x29f   : > { %611 = vrot.lane.b32.xlu0 %v582_v25, %s1049_s4 }
 0x2a2   : > { %613 = vrot.lane.b32.xlu1 %v855_v24, %s1049_s4 }
 0x304   : > { %v602_v26 = vpop.permute.xlu1 %601 }
 0x305   : > { %v624_v27 = vadd.f32 %v846_v18, %v602_v26  ;;  %v600_v28 = vpop.permute.xlu0 %599 }
 0x306   : > { %v623_v29 = vadd.f32 %v600_v28, %v552_v19 }
 0x307   : > { %v794_v30 = vmul.f32 -1.442695, %v624_v27 }
 0x308   : > { %v793_v31 = vmul.f32 -1.442695, %v623_v29  ;;  %v606_v32 = vpop.permute.xlu1 %605 }
 0x309   : > { %929 = vpow2.f32 %v794_v30  ;;  %v626_v33 = vadd.f32 %v849_v20, %v606_v32 }
 0x30a   : > { %931 = vpow2.f32 %v793_v31 }
 0x30b   : > { %v796_v34 = vmul.f32 -1.442695, %v626_v33 }
 0x30c   : > { %v604_v35 = vpop.permute.xlu1 %603 }
 0x30d   : > { %933 = vpow2.f32 %v796_v34  ;;  %v625_v36 = vadd.f32 %v604_v35, %v562_v21  ;;  %v608_v37 = vpop.permute.xlu0 %607 }
 0x30e   : > { %v627_v38 = vadd.f32 %v608_v37, %v572_v23 }
 0x30f   : > { %v795_v39 = vmul.f32 -1.442695, %v625_v36 }
 0x310   : > { %v797_v40 = vmul.f32 -1.442695, %v627_v38  ;;  %v610_v41 = vpop.permute.xlu1 %609 }
 0x311   : > { %935 = vpow2.f32 %v795_v39  ;;  %v628_v42 = vadd.f32 %v852_v22, %v610_v41  ;;  %v612_v43 = vpop.permute.xlu0 %611 }
 0x312   : > { %937 = vpow2.f32 %v797_v40  ;;  %v629_v44 = vadd.f32 %v612_v43, %v582_v25 }
 0x313   : > { %v930_v45 = vpop.eup %929  ;;  %v798_v46 = vmul.f32 -1.442695, %v628_v42 }
 0x314   : > { %v932_v47 = vpop.eup %931  ;;  %v656_v48 = vadd.f32 1.0, %v930_v45  ;;  %v799_v49 = vmul.f32 -1.442695, %v629_v44  ;;  %v614_v50 = vpop.permute.xlu1 %613 }
 0x315   : > { %v655_v51 = vadd.f32 1.0, %v932_v47  ;;  %939 = vpow2.f32 %v798_v46  ;;  %v630_v52 = vadd.f32 %v855_v24, %v614_v50 }
 0x316   : > { %941 = vrcp.f32 %v656_v48 }
 0x317   : > { %v934_v53 = vpop.eup %933  ;;  %943 = vrcp.f32 %v655_v51  ;;  %v800_v54 = vmul.f32 -1.442695, %v630_v52 }
 0x318   : > { %v658_v55 = vadd.f32 1.0, %v934_v53  ;;  %945 = vpow2.f32 %v799_v49 }
 0x319   : > { %947 = vpow2.f32 %v800_v54 }
 0x31a   : > { %949 = vrcp.f32 %v658_v55 }
 0x31b   : > { %v936_v56 = vpop.eup %935 }
 0x31c   : > { %v938_v57 = vpop.eup %937  ;;  %v657_v58 = vadd.f32 1.0, %v936_v56 }
 0x31d   : > { %v659_v59 = vadd.f32 1.0, %v938_v57 }
 0x31e   : > { %951 = vrcp.f32 %v657_v58 }
 0x31f   : > { %v940_v60 = vpop.eup %939  ;;  %953 = vrcp.f32 %v659_v59 }
 0x320   : > { %v942_v61 = vpop.eup %941  ;;  %v660_v62 = vadd.f32 1.0, %v940_v60 }
 0x321   : > { %v944_v63 = vpop.eup %943  ;;  %680 = vst.msk [vmem:[%s207_s5 + $0x8] sm:$0xff] %vm368_vm1, %v942_v61 }
 0x322   : > { %v946_v0 = vpop.eup %945  ;;  %679 = vst.msk [vmem:[%s207_s5] sm:$0xff] %vm368_vm1, %v944_v63  ;;  %955 = vrcp.f32 %v660_v62 }
 0x323   : > { %v948_v1 = vpop.eup %947  ;;  %v661_v2 = vadd.f32 1.0, %v946_v0 }
 0x324   : > { %v950_v3 = vpop.eup %949  ;;  %v662_v4 = vadd.f32 1.0, %v948_v1 }
 0x325   : > { %682 = vst.msk [vmem:[%s207_s5 + $0x18] sm:$0xff] %vm368_vm1, %v950_v3  ;;  %957 = vrcp.f32 %v661_v2 }
 0x326   : > { %959 = vrcp.f32 %v662_v4 }
 0x328   : > { %v952_v5 = vpop.eup %951 }
 0x329   : > { %v954_v6 = vpop.eup %953  ;;  %681 = vst.msk [vmem:[%s207_s5 + $0x10] sm:$0xff] %vm368_vm1, %v952_v5 }
 0x32a   : > { %683 = vst.msk [vmem:[%s207_s5 + $0x20] sm:$0xff] %vm368_vm1, %v954_v6 }
 0x32c   : > { %v956_v7 = vpop.eup %955 }
 0x32d   : > { %684 = vst.msk [vmem:[%s207_s5 + $0x28] sm:$0xff] %vm368_vm1, %v956_v7 }
 0x32f   : > { %v958_v8 = vpop.eup %957 }
 0x330   : > { %v960_v9 = vpop.eup %959  ;;  %685 = vst.msk [vmem:[%s207_s5 + $0x30] sm:$0xff] %vm368_vm1, %v958_v8 }
 0x331   : > { %686 = vst.msk [vmem:[%s207_s5 + $0x38] sm:$0xff] %vm368_vm1, %v960_v9 }
 0x332 PF: > { %s16_s17 = sadd.s32 1, %s1041_s17   ;;  %s1270_s12 = smov %s1025_s13 }
 0x333   : > { %p13_p9 = scmp.ge.s32.totalorder %s16_s17, 4   ;;  %s1271_s13 = smov %s1029_s14 }
 0x334   : > { %s1272_s14 = smov %s1119_s24  ;;  %s1273_s15 = smov %s1037_s16 }
 0x335   : > { %s1274_s16 = smov %s1276_s19  ;;  %15 = sbr.rel (!%p13_p9) target bundleno = 4 (0x4), region = 81 }
 0x33c   :  { %708 = vsyncpa [#allocation5], 1 }
 0x33d   :  { %710 = vsyncpa [#allocation5 + $0x1], 1 }

</bundles_post_ra>
